<compile_context>
chip_gen: v7x
topology: tpu7x:2x2x1
jax: 0.10.0
libtpu: 0.0.40
codegen_flags: <defaults>
</compile_context>

<pallas_src>
import math

import jax
import jax.numpy as jnp
from jax.experimental import pallas as pl
from jax.experimental.pallas import tpu as pltpu  # noqa: F401  (no TPU-specific params needed at this size)


# ------------------------------ fused Pallas kernel ------------------------------ #

def _fused_mha_kernel(x_ref, wq_ref, wk_ref, wv_ref, bq_ref, bk_ref, bv_ref,
                      wp_ref, bp_ref, o_ref):
    """Single grid point: x (B, G, E) -> out (B, G, E), fully VMEM-resident.

    Weight layout (prepared once, outside the per-call path, in prepare_params):
      wq/wk/wv : (H, E, D)  per-head (in, out) slabs; '(h d qkv)' interleave undone;
                            the 1/sqrt(E) score scale is folded into wq / bq.
      bq/bk/bv : (H, 1, D)
      wp       : (H, D, E)  per-head row slabs of the (in, out) output projection
      bp       : (1, E)
    """
    B, G, E = x_ref.shape
    H, _, D = wq_ref.shape

    wq, wk, wv = wq_ref[...], wk_ref[...], wv_ref[...]
    bq, bk, bv = bq_ref[...], bk_ref[...], bv_ref[...]
    wp, bp = wp_ref[...], bp_ref[...]

    for b in range(B):  # tiny static batch unroll (replaces the old grid=(B,))
        xb = x_ref[b].astype(jnp.float32)                    # (G, E)
        xh = jnp.broadcast_to(xb, (H, G, E))                 # heads become the MXU batch dim

        # QKV projections: one head-batched matmul each, no slices / transposes.
        q = jnp.einsum('hge,hed->hgd', xh, wq,
                       preferred_element_type=jnp.float32) + bq      # (H, G, D), pre-scaled
        k = jnp.einsum('hge,hed->hgd', xh, wk,
                       preferred_element_type=jnp.float32) + bk
        v = jnp.einsum('hge,hed->hgd', xh, wv,
                       preferred_element_type=jnp.float32) + bv

        # Scaled-dot-product attention for all heads at once (scale already folded).
        s = jnp.einsum('hqd,hkd->hqk', q, k,
                       preferred_element_type=jnp.float32)           # (H, G, G)
        s = s - jnp.max(s, axis=-1, keepdims=True)                   # stable softmax
        p = jnp.exp(s)
        inv_l = pl.reciprocal(jnp.sum(p, axis=-1, keepdims=True), approx=True)  # EUP slot
        p = p * inv_l
        # TODO(synk): training-mode attention dropout would mask p here (eval => identity);
        #             the module's `self.attn` side effect is not materialized.

        ctx = jnp.einsum('hqk,hkd->hqd', p, v,
                         preferred_element_type=jnp.float32)         # (H, G, D)

        # Output projection: contract heads via a batched matmul + cheap leading-axis sum,
        # so 'b h g d -> b g (h d)' never needs an in-kernel transpose / concat.
        out = jnp.einsum('hgd,hde->hge', ctx, wp,
                         preferred_element_type=jnp.float32)         # (H, G, E)
        out = jnp.sum(out, axis=0) + bp                              # (G, E)
        o_ref[b] = out.astype(o_ref.dtype)


# --------------------------- one-time parameter prep ------------------------------ #

def prepare_params(params, *, emb_size, num_heads):
    """One-time re-layout of the PyTorch-layout weights into kernel-friendly per-head
    (in, out) slabs.  Also folds the 1/sqrt(emb_size) score scale into W_q / b_q.
    Call once; do NOT put this in the per-call forward path."""
    E, H = emb_size, num_heads
    D = E // H
    scale = 1.0 / math.sqrt(E)     # reference divides the energies by sqrt(emb_size)

    # qkv weight rows are ordered '(h d qkv)' with qkv innermost.
    w = params["w_qkv"].reshape(H, D, 3, E)            # (h, d, which, in)
    b = params["b_qkv"].reshape(H, D, 3)
    wq = jnp.transpose(w[:, :, 0, :], (0, 2, 1)) * scale   # (H, E, D)
    wk = jnp.transpose(w[:, :, 1, :], (0, 2, 1))
    wv = jnp.transpose(w[:, :, 2, :], (0, 2, 1))
    bq = b[:, :, 0].reshape(H, 1, D) * scale
    bk = b[:, :, 1].reshape(H, 1, D)
    bv = b[:, :, 2].reshape(H, 1, D)

    # Projection: (out, in) -> per-head (H, D_in, E_out), matching the '(h d)' ctx layout.
    wp = jnp.transpose(params["w_proj"].reshape(E, H, D), (1, 2, 0))   # (H, D, E)
    bp = params["b_proj"].reshape(1, E)
    return dict(wq=wq, wk=wk, wv=wv, bq=bq, bk=bk, bv=bv, wp=wp, bp=bp)


# --------------------------------- wrapper ---------------------------------------- #

def multi_head_attention_forward(x, prepped):
    """Per-call path: a single gridless pallas_call, no per-call weight re-layout ops."""
    B, G, E = x.shape
    return pl.pallas_call(
        _fused_mha_kernel,
        out_shape=jax.ShapeDtypeStruct((B, G, E), x.dtype),
    )(x, prepped["wq"], prepped["wk"], prepped["wv"],
      prepped["bq"], prepped["bk"], prepped["bv"],
      prepped["wp"], prepped["bp"])


# -------------------------- params & pure-JAX reference --------------------------- #

def init_params(key, emb_size):
    """Deterministic init matching nn.Linear default shapes (U(-1/sqrt(in), 1/sqrt(in)))."""
    k1, k2, k3, k4 = jax.random.split(key, 4)
    bound = 1.0 / math.sqrt(emb_size)
    return {
        "w_qkv": jax.random.uniform(k1, (3 * emb_size, emb_size), jnp.float32, -bound, bound),
        "b_qkv": jax.random.uniform(k2, (3 * emb_size,), jnp.float32, -bound, bound),
        "w_proj": jax.random.uniform(k3, (emb_size, emb_size), jnp.float32, -bound, bound),
        "b_proj": jax.random.uniform(k4, (emb_size,), jnp.float32, -bound, bound),
    }


def reference_forward(x, params, *, emb_size, num_heads):
    """Straight transcription of the PyTorch module (eval mode), for the sanity check."""
    B, G, E = x.shape
    H, D = num_heads, E // num_heads
    hp = jax.lax.Precision.HIGHEST
    qkv = jnp.einsum('bge,fe->bgf', x, params["w_qkv"], precision=hp) + params["b_qkv"]
    qkv = qkv.reshape(B, G, H, D, 3)
    qkv = jnp.transpose(qkv, (4, 0, 2, 1, 3))               # (3, B, H, G, D)
    q, k, v = qkv[0], qkv[1], qkv[2]
    energy = jnp.einsum('bhqd,bhkd->bhqk', q, k, precision=hp)
    att = jax.nn.softmax(energy / (emb_size ** 0.5), axis=-1)
    out = jnp.einsum('bhqk,bhkd->bhqd', att, v, precision=hp)
    out = jnp.transpose(out, (0, 2, 1, 3)).reshape(B, G, E)
    return jnp.einsum('bge,fe->bgf', out, params["w_proj"], precision=hp) + params["b_proj"]


# ----------------------------------- main ----------------------------------------- #

if __name__ == "__main__":
    EMB = 32
    HEADS = 4
    BATCH = 2
    SEQ = 8

    key = jax.random.PRNGKey(0)
    kx, kp = jax.random.split(key)

    x = jax.random.normal(kx, (BATCH, SEQ, EMB), dtype=jnp.float32)
    params = init_params(kp, EMB)

    # One-time weight re-layout + scale folding, hoisted out of the per-call path.
    prepped = prepare_params(params, emb_size=EMB, num_heads=HEADS)

    fwd = jax.jit(multi_head_attention_forward)
    out = fwd(x, prepped)
    jax.block_until_ready(out)

    assert out.shape == (BATCH, SEQ, EMB), out.shape
    ref = reference_forward(x, params, emb_size=EMB, num_heads=HEADS)
    # Tolerance sized for the approximate (EUP) reciprocal in the softmax denominator;
    # with approx=False the all-f32 kernel tracks the HIGHEST-precision reference ~1e-5.
    err = float(jnp.max(jnp.abs(out - ref)))
    assert jnp.allclose(out, ref, atol=5e-3, rtol=5e-3), err
    print("KERNEL_OK")
</pallas_src>

<mosaic_0001>
module attributes {stable_mosaic.version = 11 : i64} {
  func.func @_fused_mha_kernel(%arg0: memref<2x8x32xf32, #tpu.memory_space<vmem>>, %arg1: memref<4x32x8xf32, #tpu.memory_space<vmem>>, %arg2: memref<4x32x8xf32, #tpu.memory_space<vmem>>, %arg3: memref<4x32x8xf32, #tpu.memory_space<vmem>>, %arg4: memref<4x1x8xf32, #tpu.memory_space<vmem>>, %arg5: memref<4x1x8xf32, #tpu.memory_space<vmem>>, %arg6: memref<4x1x8xf32, #tpu.memory_space<vmem>>, %arg7: memref<4x8x32xf32, #tpu.memory_space<vmem>>, %arg8: memref<1x32xf32, #tpu.memory_space<vmem>>, %arg9: memref<2x8x32xf32, #tpu.memory_space<vmem>>) attributes {dimension_semantics = [], scalar_prefetch = 0 : i64, scratch_operands = 0 : i64, tpu.core_type = #tpu.core_type<tc>} {
    %c0 = arith.constant 0 : index
    %c0_0 = arith.constant 0 : index
    %c0_1 = arith.constant 0 : index
    %0 = vector.load %arg1[%c0, %c0_0, %c0_1] : memref<4x32x8xf32, #tpu.memory_space<vmem>>, vector<4x32x8xf32>
    %c0_2 = arith.constant 0 : index
    %c0_3 = arith.constant 0 : index
    %c0_4 = arith.constant 0 : index
    %1 = vector.load %arg2[%c0_2, %c0_3, %c0_4] : memref<4x32x8xf32, #tpu.memory_space<vmem>>, vector<4x32x8xf32>
    %c0_5 = arith.constant 0 : index
    %c0_6 = arith.constant 0 : index
    %c0_7 = arith.constant 0 : index
    %2 = vector.load %arg3[%c0_5, %c0_6, %c0_7] : memref<4x32x8xf32, #tpu.memory_space<vmem>>, vector<4x32x8xf32>
    %c0_8 = arith.constant 0 : index
    %c0_9 = arith.constant 0 : index
    %c0_10 = arith.constant 0 : index
    %3 = vector.load %arg4[%c0_8, %c0_9, %c0_10] : memref<4x1x8xf32, #tpu.memory_space<vmem>>, vector<4x1x8xf32>
    %c0_11 = arith.constant 0 : index
    %c0_12 = arith.constant 0 : index
    %c0_13 = arith.constant 0 : index
    %4 = vector.load %arg5[%c0_11, %c0_12, %c0_13] : memref<4x1x8xf32, #tpu.memory_space<vmem>>, vector<4x1x8xf32>
    %c0_14 = arith.constant 0 : index
    %c0_15 = arith.constant 0 : index
    %c0_16 = arith.constant 0 : index
    %5 = vector.load %arg6[%c0_14, %c0_15, %c0_16] : memref<4x1x8xf32, #tpu.memory_space<vmem>>, vector<4x1x8xf32>
    %c0_17 = arith.constant 0 : index
    %c0_18 = arith.constant 0 : index
    %c0_19 = arith.constant 0 : index
    %6 = vector.load %arg7[%c0_17, %c0_18, %c0_19] : memref<4x8x32xf32, #tpu.memory_space<vmem>>, vector<4x8x32xf32>
    %c0_20 = arith.constant 0 : index
    %c0_21 = arith.constant 0 : index
    %7 = vector.load %arg8[%c0_20, %c0_21] : memref<1x32xf32, #tpu.memory_space<vmem>>, vector<1x32xf32>
    %c0_22 = arith.constant 0 : index
    %c0_23 = arith.constant 0 : index
    %c0_24 = arith.constant 0 : index
    %8 = vector.load %arg0[%c0_22, %c0_23, %c0_24] : memref<2x8x32xf32, #tpu.memory_space<vmem>>, vector<1x8x32xf32>
    %9 = vector.shape_cast %8 : vector<1x8x32xf32> to vector<8x32xf32>
    %10 = vector.shape_cast %9 : vector<8x32xf32> to vector<1x8x32xf32>
    %11 = vector.broadcast %10 : vector<1x8x32xf32> to vector<4x8x32xf32>
    "tpu.trace_start"() <{level = 10 : i32, message = "hge,hed->hgd"}> : () -> ()
    %cst = arith.constant dense<0.000000e+00> : vector<4x8x8xf32>
    %12 = tpu.matmul %11, %0, %cst {dimension_numbers = #tpu.dot_dimension_numbers<[2], [1], [1], [2], [0, 0, 0, 1, 1, 2], [0], [0]>} : vector<4x8x32xf32>, vector<4x32x8xf32>, vector<4x8x8xf32> -> vector<4x8x8xf32>
    "tpu.trace_stop"() : () -> ()
    %13 = vector.broadcast %3 : vector<4x1x8xf32> to vector<4x8x8xf32>
    %14 = arith.addf %12, %13 : vector<4x8x8xf32>
    "tpu.trace_start"() <{level = 10 : i32, message = "hge,hed->hgd"}> : () -> ()
    %cst_25 = arith.constant dense<0.000000e+00> : vector<4x8x8xf32>
    %15 = tpu.matmul %11, %1, %cst_25 {dimension_numbers = #tpu.dot_dimension_numbers<[2], [1], [1], [2], [0, 0, 0, 1, 1, 2], [0], [0]>} : vector<4x8x32xf32>, vector<4x32x8xf32>, vector<4x8x8xf32> -> vector<4x8x8xf32>
    "tpu.trace_stop"() : () -> ()
    %16 = vector.broadcast %4 : vector<4x1x8xf32> to vector<4x8x8xf32>
    %17 = arith.addf %15, %16 : vector<4x8x8xf32>
    "tpu.trace_start"() <{level = 10 : i32, message = "hge,hed->hgd"}> : () -> ()
    %cst_26 = arith.constant dense<0.000000e+00> : vector<4x8x8xf32>
    %18 = tpu.matmul %11, %2, %cst_26 {dimension_numbers = #tpu.dot_dimension_numbers<[2], [1], [1], [2], [0, 0, 0, 1, 1, 2], [0], [0]>} : vector<4x8x32xf32>, vector<4x32x8xf32>, vector<4x8x8xf32> -> vector<4x8x8xf32>
    "tpu.trace_stop"() : () -> ()
    %19 = vector.broadcast %5 : vector<4x1x8xf32> to vector<4x8x8xf32>
    %20 = arith.addf %18, %19 : vector<4x8x8xf32>
    "tpu.trace_start"() <{level = 10 : i32, message = "hqd,hkd->hqk"}> : () -> ()
    %cst_27 = arith.constant dense<0.000000e+00> : vector<4x8x8xf32>
    %21 = tpu.matmul %14, %17, %cst_27 {dimension_numbers = #tpu.dot_dimension_numbers<[2], [2], [1], [1], [0, 0, 0, 1, 1, 1], [0], [0]>} : vector<4x8x8xf32>, vector<4x8x8xf32>, vector<4x8x8xf32> -> vector<4x8x8xf32>
    "tpu.trace_stop"() : () -> ()
    %cst_28 = arith.constant dense<0xFF800000> : vector<4x8xf32>
    %22 = vector.multi_reduction <maximumf>, %21, %cst_28 [2] : vector<4x8x8xf32> to vector<4x8xf32>
    %23 = vector.shape_cast %22 : vector<4x8xf32> to vector<4x8x1xf32>
    %24 = vector.broadcast %23 : vector<4x8x1xf32> to vector<4x8x8xf32>
    %25 = arith.subf %21, %24 : vector<4x8x8xf32>
    %26 = math.exp %25 : vector<4x8x8xf32>
    %cst_29 = arith.constant dense<0.000000e+00> : vector<4x8xf32>
    %27 = vector.multi_reduction <add>, %26, %cst_29 [2] : vector<4x8x8xf32> to vector<4x8xf32>
    %28 = vector.shape_cast %27 : vector<4x8xf32> to vector<4x8x1xf32>
    %29 = tpu.reciprocal %28 {approx = true} : vector<4x8x1xf32> -> vector<4x8x1xf32>
    %30 = vector.broadcast %29 : vector<4x8x1xf32> to vector<4x8x8xf32>
    %31 = arith.mulf %26, %30 : vector<4x8x8xf32>
    "tpu.trace_start"() <{level = 10 : i32, message = "hqk,hkd->hqd"}> : () -> ()
    %cst_30 = arith.constant dense<0.000000e+00> : vector<4x8x8xf32>
    %32 = tpu.matmul %31, %20, %cst_30 {dimension_numbers = #tpu.dot_dimension_numbers<[2], [1], [1], [2], [0, 0, 0, 1, 1, 2], [0], [0]>} : vector<4x8x8xf32>, vector<4x8x8xf32>, vector<4x8x8xf32> -> vector<4x8x8xf32>
    "tpu.trace_stop"() : () -> ()
    "tpu.trace_start"() <{level = 10 : i32, message = "hgd,hde->hge"}> : () -> ()
    %cst_31 = arith.constant dense<0.000000e+00> : vector<4x8x32xf32>
    %33 = tpu.matmul %32, %6, %cst_31 {dimension_numbers = #tpu.dot_dimension_numbers<[2], [1], [1], [2], [0, 0, 0, 1, 1, 2], [0], [0]>} : vector<4x8x8xf32>, vector<4x8x32xf32>, vector<4x8x32xf32> -> vector<4x8x32xf32>
    "tpu.trace_stop"() : () -> ()
    %cst_32 = arith.constant dense<0.000000e+00> : vector<8x32xf32>
    %34 = vector.multi_reduction <add>, %33, %cst_32 [0] : vector<4x8x32xf32> to vector<8x32xf32>
    %35 = vector.broadcast %7 : vector<1x32xf32> to vector<8x32xf32>
    %36 = arith.addf %34, %35 : vector<8x32xf32>
    %c0_33 = arith.constant 0 : index
    %c0_34 = arith.constant 0 : index
    %c0_35 = arith.constant 0 : index
    %37 = vector.load %arg9[%c0_33, %c0_34, %c0_35] : memref<2x8x32xf32, #tpu.memory_space<vmem>>, vector<1x8x32xf32>
    %38 = vector.shape_cast %37 : vector<1x8x32xf32> to vector<8x32xf32>
    %39 = vector.shape_cast %36 : vector<8x32xf32> to vector<1x8x32xf32>
    tpu.vector_store %arg9[%c0_33, %c0_34, %c0_35], %39 {strides = array<i32>} : memref<2x8x32xf32, #tpu.memory_space<vmem>>, vector<1x8x32xf32>,
    %c1 = arith.constant 1 : index
    %c0_36 = arith.constant 0 : index
    %c0_37 = arith.constant 0 : index
    %40 = vector.load %arg0[%c1, %c0_36, %c0_37] : memref<2x8x32xf32, #tpu.memory_space<vmem>>, vector<1x8x32xf32>
    %41 = vector.shape_cast %40 : vector<1x8x32xf32> to vector<8x32xf32>
    %42 = vector.shape_cast %41 : vector<8x32xf32> to vector<1x8x32xf32>
    %43 = vector.broadcast %42 : vector<1x8x32xf32> to vector<4x8x32xf32>
    "tpu.trace_start"() <{level = 10 : i32, message = "hge,hed->hgd"}> : () -> ()
    %cst_38 = arith.constant dense<0.000000e+00> : vector<4x8x8xf32>
    %44 = tpu.matmul %43, %0, %cst_38 {dimension_numbers = #tpu.dot_dimension_numbers<[2], [1], [1], [2], [0, 0, 0, 1, 1, 2], [0], [0]>} : vector<4x8x32xf32>, vector<4x32x8xf32>, vector<4x8x8xf32> -> vector<4x8x8xf32>
    "tpu.trace_stop"() : () -> ()
    %45 = vector.broadcast %3 : vector<4x1x8xf32> to vector<4x8x8xf32>
    %46 = arith.addf %44, %45 : vector<4x8x8xf32>
    "tpu.trace_start"() <{level = 10 : i32, message = "hge,hed->hgd"}> : () -> ()
    %cst_39 = arith.constant dense<0.000000e+00> : vector<4x8x8xf32>
    %47 = tpu.matmul %43, %1, %cst_39 {dimension_numbers = #tpu.dot_dimension_numbers<[2], [1], [1], [2], [0, 0, 0, 1, 1, 2], [0], [0]>} : vector<4x8x32xf32>, vector<4x32x8xf32>, vector<4x8x8xf32> -> vector<4x8x8xf32>
    "tpu.trace_stop"() : () -> ()
    %48 = vector.broadcast %4 : vector<4x1x8xf32> to vector<4x8x8xf32>
    %49 = arith.addf %47, %48 : vector<4x8x8xf32>
    "tpu.trace_start"() <{level = 10 : i32, message = "hge,hed->hgd"}> : () -> ()
    %cst_40 = arith.constant dense<0.000000e+00> : vector<4x8x8xf32>
    %50 = tpu.matmul %43, %2, %cst_40 {dimension_numbers = #tpu.dot_dimension_numbers<[2], [1], [1], [2], [0, 0, 0, 1, 1, 2], [0], [0]>} : vector<4x8x32xf32>, vector<4x32x8xf32>, vector<4x8x8xf32> -> vector<4x8x8xf32>
    "tpu.trace_stop"() : () -> ()
    %51 = vector.broadcast %5 : vector<4x1x8xf32> to vector<4x8x8xf32>
    %52 = arith.addf %50, %51 : vector<4x8x8xf32>
    "tpu.trace_start"() <{level = 10 : i32, message = "hqd,hkd->hqk"}> : () -> ()
    %cst_41 = arith.constant dense<0.000000e+00> : vector<4x8x8xf32>
    %53 = tpu.matmul %46, %49, %cst_41 {dimension_numbers = #tpu.dot_dimension_numbers<[2], [2], [1], [1], [0, 0, 0, 1, 1, 1], [0], [0]>} : vector<4x8x8xf32>, vector<4x8x8xf32>, vector<4x8x8xf32> -> vector<4x8x8xf32>
    "tpu.trace_stop"() : () -> ()
    %cst_42 = arith.constant dense<0xFF800000> : vector<4x8xf32>
    %54 = vector.multi_reduction <maximumf>, %53, %cst_42 [2] : vector<4x8x8xf32> to vector<4x8xf32>
    %55 = vector.shape_cast %54 : vector<4x8xf32> to vector<4x8x1xf32>
    %56 = vector.broadcast %55 : vector<4x8x1xf32> to vector<4x8x8xf32>
    %57 = arith.subf %53, %56 : vector<4x8x8xf32>
    %58 = math.exp %57 : vector<4x8x8xf32>
    %cst_43 = arith.constant dense<0.000000e+00> : vector<4x8xf32>
    %59 = vector.multi_reduction <add>, %58, %cst_43 [2] : vector<4x8x8xf32> to vector<4x8xf32>
    %60 = vector.shape_cast %59 : vector<4x8xf32> to vector<4x8x1xf32>
    %61 = tpu.reciprocal %60 {approx = true} : vector<4x8x1xf32> -> vector<4x8x1xf32>
    %62 = vector.broadcast %61 : vector<4x8x1xf32> to vector<4x8x8xf32>
    %63 = arith.mulf %58, %62 : vector<4x8x8xf32>
    "tpu.trace_start"() <{level = 10 : i32, message = "hqk,hkd->hqd"}> : () -> ()
    %cst_44 = arith.constant dense<0.000000e+00> : vector<4x8x8xf32>
    %64 = tpu.matmul %63, %52, %cst_44 {dimension_numbers = #tpu.dot_dimension_numbers<[2], [1], [1], [2], [0, 0, 0, 1, 1, 2], [0], [0]>} : vector<4x8x8xf32>, vector<4x8x8xf32>, vector<4x8x8xf32> -> vector<4x8x8xf32>
    "tpu.trace_stop"() : () -> ()
    "tpu.trace_start"() <{level = 10 : i32, message = "hgd,hde->hge"}> : () -> ()
    %cst_45 = arith.constant dense<0.000000e+00> : vector<4x8x32xf32>
    %65 = tpu.matmul %64, %6, %cst_45 {dimension_numbers = #tpu.dot_dimension_numbers<[2], [1], [1], [2], [0, 0, 0, 1, 1, 2], [0], [0]>} : vector<4x8x8xf32>, vector<4x8x32xf32>, vector<4x8x32xf32> -> vector<4x8x32xf32>
    "tpu.trace_stop"() : () -> ()
    %cst_46 = arith.constant dense<0.000000e+00> : vector<8x32xf32>
    %66 = vector.multi_reduction <add>, %65, %cst_46 [0] : vector<4x8x32xf32> to vector<8x32xf32>
    %67 = vector.broadcast %7 : vector<1x32xf32> to vector<8x32xf32>
    %68 = arith.addf %66, %67 : vector<8x32xf32>
    %c1_47 = arith.constant 1 : index
    %c0_48 = arith.constant 0 : index
    %c0_49 = arith.constant 0 : index
    %69 = vector.load %arg9[%c1_47, %c0_48, %c0_49] : memref<2x8x32xf32, #tpu.memory_space<vmem>>, vector<1x8x32xf32>
    %70 = vector.shape_cast %69 : vector<1x8x32xf32> to vector<8x32xf32>
    %71 = vector.shape_cast %68 : vector<8x32xf32> to vector<1x8x32xf32>
    tpu.vector_store %arg9[%c1_47, %c0_48, %c0_49], %71 {strides = array<i32>} : memref<2x8x32xf32, #tpu.memory_space<vmem>>, vector<1x8x32xf32>,
    return
  }
}

</mosaic_0001>

<bundles_post_ra>
// kernel: multi_head_attention_forward.1
= control target key start
LH: loop header
LB: loop body
LE: loop exit
PB: predicated region body
PF: predicated region fallthrough
CT: control target
= control target key end

     0   :  { %v4594_v3 = vmov 0.0|0.0   ;;  %vm4595_vm0 = vmmov 0   ;;  %v4596_v11 = vmov 0.0   ;;  %vm123_vm1 = vcmask 261120   ;;  %s5311_s0 = inlined_call_operand.vmem [shape: f32[2,8,32], index: 0, kind: input, shape index: {}]   ;;  %s5312_s1 = inlined_call_operand.vmem [shape: f32[4,32,8], index: 1, kind: input, shape index: {}]   ;;  %s5313_s2 = inlined_call_operand.vmem [shape: f32[4,32,8], index: 2, kind: input, shape index: {}]   ;;  %s5314_s3 = inlined_call_operand.vmem [shape: f32[4,32,8], index: 3, kind: input, shape index: {}]   ;;  %s5315_s4 = inlined_call_operand.vmem [shape: f32[4,1,8], index: 4, kind: input, shape index: {}]   ;;  %s5316_s5 = inlined_call_operand.vmem [shape: f32[4,1,8], index: 5, kind: input, shape index: {}]   ;;  %s5317_s6 = inlined_call_operand.vmem [shape: f32[4,1,8], index: 6, kind: input, shape index: {}]   ;;  %s5318_s7 = inlined_call_operand.vmem [shape: f32[4,8,32], index: 7, kind: input, shape index: {}]   ;;  %s5319_s8 = inlined_call_operand.vmem [shape: f32[1,32], index: 8, kind: input, shape index: {}]   ;;  %s5320_s9 = inlined_call_operand.hbm [shape: f32[2,8,32], index: 9, kind: output, shape index: {}]  }
   0x1   :  { %v33_v0 = vld [vmem:[%s5312_s1] sm:$0xff]  ;;  %v34_v1 = vld [vmem:[%s5312_s1 + $0x8] sm:$0xff]  ;;  %4388 = vmatprep.subr.bf16.mxu0 %v4594_v3  ;;  %4394 = vmatprep.subr.bf16.mxu1 %v4594_v3  ;;  %v35_v6 = vld [vmem:[%s5312_s1 + $0x10] sm:$0xff] }
   0x2   :  { %v37_v2 = vld [vmem:[%s5312_s1 + $0x20] sm:$0xff]  ;;  %v4661_v4 = vpack.c.bf16 %v34_v1, %v33_v0  ;;  %v38_v5 = vld [vmem:[%s5312_s1 + $0x28] sm:$0xff]  ;;  %v36_v7 = vld [vmem:[%s5312_s1 + $0x18] sm:$0xff]  ;;  %4012 = vmatprep.mubr.msk.f32.mxu0 %vm4595_vm0, %v4596_v11  ;;  %4023 = vmatprep.mubr.msk.f32.mxu1 %vm4595_vm0, %v4596_v11 }
   0x3   :  { %v4672_v8 = vpack.c.bf16 %v38_v5, %v37_v2  ;;  %v39_v9 = vld [vmem:[%s5312_s1 + $0x30] sm:$0xff]  ;;  %v40_v10 = vld [vmem:[%s5312_s1 + $0x38] sm:$0xff]  ;;  %v4685_v12 = vpack.c.bf16 %v36_v7, %v35_v6  ;;  %v41_v14 = vld [vmem:[%s5312_s1 + $0x40] sm:$0xff] }
   0x4   :  { %4390 = vmatpush3.bf16.msra.mxu0 %v4661_v4  ;;  %v4689_v13 = vpack.c.bf16 %v40_v10, %v39_v9  ;;  %v42_v15 = vld [vmem:[%s5312_s1 + $0x48] sm:$0xff]  ;;  %v45_v16 = vld [vmem:[%s5312_s1 + $0x60] sm:$0xff]  ;;  %v43_v21 = vld [vmem:[%s5312_s1 + $0x50] sm:$0xff] }
   0x5   :  { %4396 = vmatpush3.bf16.msra.mxu1 %v4672_v8  ;;  %4391 = vmatprep.subr.bf16.mxu0 %v4594_v3  ;;  %v46_v17 = vld [vmem:[%s5312_s1 + $0x68] sm:$0xff]  ;;  %v4708_v18 = vld [vmem:[%s5311_s0] sm:$0xff]  ;;  %v4710_v19 = vpack.c.bf16 %v42_v15, %v41_v14  ;;  %v44_v22 = vld [vmem:[%s5312_s1 + $0x58] sm:$0xff] }
   0x6   :  { %4397 = vmatprep.subr.bf16.mxu1 %v4594_v3  ;;  %v4714_v20 = vpack.c.bf16 %v46_v17, %v45_v16  ;;  %v47_v23 = vld [vmem:[%s5312_s1 + $0x70] sm:$0xff]  ;;  %v48_v24 = vld [vmem:[%s5312_s1 + $0x78] sm:$0xff]  ;;  %v4734_v25 = vpack.c.bf16 %v44_v22, %v43_v21  ;;  %v49_v27 = vld [vmem:[%s5313_s2] sm:$0xff] }
   0x7   :  { %v4738_v26 = vpack.c.bf16 %v48_v24, %v47_v23  ;;  %v50_v28 = vld [vmem:[%s5313_s2 + $0x8] sm:$0xff] }
   0x8   :  { %4393 = vmatpush3.bf16.msra.mxu0 %v4685_v12 }
   0x9   :  { %4399 = vmatpush3.bf16.msra.mxu1 %v4689_v13  ;;  %4400 = vmatprep.subr.bf16.mxu0 %v4594_v3 }
   0xa   :  { %4406 = vmatprep.subr.bf16.mxu1 %v4594_v3 }
   0xb   :  { %4013 = vmatmul.mubr.msk.f32.vlgmr.msra.gmra.mrb[0].mxu0 %vm123_vm1, %v4708_v18 }
   0xc   :  { %4024 = vmatmul.mubr.msk.f32.vlgmr.msra.gmra.mrb[0].mxu1 %vm123_vm1, %v4708_v18  ;;  %4402 = vmatpush3.bf16.msra.mxu0 %v4710_v19 }
   0xd   :  { %4408 = vmatpush3.bf16.msra.mxu1 %v4714_v20  ;;  %4403 = vmatprep.subr.bf16.mxu0 %v4594_v3 }
   0xe   :  { %14 = vsyncpa [#allocation3], 0  ;;  %4409 = vmatprep.subr.bf16.mxu1 %v4594_v3  ;;  %4034 = vmatprep.mubr.msk.f32.mxu0 %vm4595_vm0, %v4596_v11  ;;  %v53_v29 = vld [vmem:[%s5313_s2 + $0x20] sm:$0xff]  ;;  %v54_v30 = vld [vmem:[%s5313_s2 + $0x28] sm:$0xff]  ;;  %v4758_v31 = vpack.c.bf16 %v50_v28, %v49_v27  ;;  %vm1015_vm2 = vcmask 64512  }
   0xf   :  { %4045 = vmatprep.mubr.msk.f32.mxu1 %vm4595_vm0, %v4596_v11  ;;  %v4762_v32 = vpack.c.bf16 %v54_v30, %v53_v29  ;;  %v51_v33 = vld [vmem:[%s5313_s2 + $0x10] sm:$0xff]  ;;  %v52_v34 = vld [vmem:[%s5313_s2 + $0x18] sm:$0xff]  ;;  %v57_v39 = vld [vmem:[%s5313_s2 + $0x40] sm:$0xff] }
  0x10   :  { %4405 = vmatpush3.bf16.msra.mxu0 %v4734_v25  ;;  %v55_v35 = vld [vmem:[%s5313_s2 + $0x30] sm:$0xff]  ;;  %v56_v36 = vld [vmem:[%s5313_s2 + $0x38] sm:$0xff]  ;;  %v4782_v37 = vpack.c.bf16 %v52_v34, %v51_v33  ;;  %v58_v40 = vld [vmem:[%s5313_s2 + $0x48] sm:$0xff] }
  0x11   :  { %4411 = vmatpush3.bf16.msra.mxu1 %v4738_v26  ;;  %4412 = vmatprep.subr.bf16.mxu0 %v4594_v3  ;;  %v4786_v38 = vpack.c.bf16 %v56_v36, %v55_v35  ;;  %v61_v41 = vld [vmem:[%s5313_s2 + $0x60] sm:$0xff]  ;;  %v62_v42 = vld [vmem:[%s5313_s2 + $0x68] sm:$0xff]  ;;  %v4806_v43 = vpack.c.bf16 %v58_v40, %v57_v39  ;;  %v59_v45 = vld [vmem:[%s5313_s2 + $0x50] sm:$0xff] }
  0x12   :  { %4418 = vmatprep.subr.bf16.mxu1 %v4594_v3  ;;  %v4810_v44 = vpack.c.bf16 %v62_v42, %v61_v41  ;;  %v60_v46 = vld [vmem:[%s5313_s2 + $0x58] sm:$0xff]  ;;  %v63_v47 = vld [vmem:[%s5313_s2 + $0x70] sm:$0xff]  ;;  %v65_v51 = vld [vmem:[%s5314_s3] sm:$0xff] }
  0x13   :  { %4035 = vmatmul.mubr.msk.f32.vlgmr.msra.gmra.mrb[2].mxu0 %vm123_vm1, %v4708_v18  ;;  %v64_v48 = vld [vmem:[%s5313_s2 + $0x78] sm:$0xff]  ;;  %v4830_v49 = vpack.c.bf16 %v60_v46, %v59_v45  ;;  %v66_v52 = vld [vmem:[%s5314_s3 + $0x8] sm:$0xff]  ;;  %v69_v53 = vld [vmem:[%s5314_s3 + $0x20] sm:$0xff] }
  0x14   :  { %4046 = vmatmul.mubr.msk.f32.vlgmr.msra.gmra.mrb[2].mxu1 %vm123_vm1, %v4708_v18  ;;  %4414 = vmatpush3.bf16.msra.mxu0 %v4758_v31  ;;  %v4834_v50 = vpack.c.bf16 %v64_v48, %v63_v47  ;;  %v70_v54 = vld [vmem:[%s5314_s3 + $0x28] sm:$0xff]  ;;  %v4854_v55 = vpack.c.bf16 %v66_v52, %v65_v51  ;;  %v67_v57 = vld [vmem:[%s5314_s3 + $0x10] sm:$0xff]  ;;  %v68_v58 = vld [vmem:[%s5314_s3 + $0x18] sm:$0xff] }
  0x15   :  { %4420 = vmatpush3.bf16.msra.mxu1 %v4762_v32  ;;  %4415 = vmatprep.subr.bf16.mxu0 %v4594_v3  ;;  %v4858_v56 = vpack.c.bf16 %v70_v54, %v69_v53  ;;  %v71_v59 = vld [vmem:[%s5314_s3 + $0x30] sm:$0xff]  ;;  %v4882_v60 = vpack.c.bf16 %v68_v58, %v67_v57  ;;  %v72_v61 = vld [vmem:[%s5314_s3 + $0x38] sm:$0xff]  ;;  %v73_v63 = vld [vmem:[%s5314_s3 + $0x40] sm:$0xff] }
  0x16   :  { %4421 = vmatprep.subr.bf16.mxu1 %v4594_v3  ;;  %4056 = vmatprep.mubr.msk.f32.mxu0 %vm4595_vm0, %v4596_v11  ;;  %v4887_v62 = vpack.c.bf16 %v72_v61, %v71_v59  ;;  %v74_v0 = vld [vmem:[%s5314_s3 + $0x48] sm:$0xff]  ;;  %v77_v1 = vld [vmem:[%s5314_s3 + $0x60] sm:$0xff]  ;;  %v75_v7 = vld [vmem:[%s5314_s3 + $0x50] sm:$0xff] }
  0x17   :  { %4067 = vmatprep.mubr.msk.f32.mxu1 %vm4595_vm0, %v4596_v11  ;;  %v4899_v2 = vpack.c.bf16 %v74_v0, %v73_v63  ;;  %v78_v5 = vld [vmem:[%s5314_s3 + $0x68] sm:$0xff]  ;;  %v76_v9 = vld [vmem:[%s5314_s3 + $0x58] sm:$0xff]  ;;  %v79_v10 = vld [vmem:[%s5314_s3 + $0x70] sm:$0xff] }
  0x18   :  { %4417 = vmatpush3.bf16.msra.mxu0 %v4782_v37  ;;  %v4906_v6 = vpack.c.bf16 %v78_v5, %v77_v1  ;;  %v4926_v14 = vpack.c.bf16 %v76_v9, %v75_v7  ;;  %v80_v15 = vld [vmem:[%s5314_s3 + $0x78] sm:$0xff]  ;;  %v4952_v30 = vld [vmem:[%s5316_s5] ss:$0 sm:$0xff]  ;;  %v4968_v40 = vld [vmem:[%s5315_s4 + $0x1] ss:$0 sm:$0xff] }
  0x19   :  { %4423 = vmatpush3.bf16.msra.mxu1 %v4786_v38  ;;  %4424 = vmatprep.subr.bf16.mxu0 %v4594_v3  ;;  %v4933_v16 = vpack.c.bf16 %v80_v15, %v79_v10  ;;  %v4962_v34 = vld [vmem:[%s5315_s4] ss:$0 sm:$0xff]  ;;  %v4981_v47 = vld [vmem:[%s5316_s5 + $0x2] ss:$0 sm:$0xff]  ;;  %v4987_v48 = vld [vmem:[%s5316_s5 + $0x3] ss:$0 sm:$0xff] }
  0x1a   :  { %4430 = vmatprep.subr.bf16.mxu1 %v4594_v3  ;;  %v4996_v52 = vld [vmem:[%s5315_s4 + $0x2] ss:$0 sm:$0xff]  ;;  %v5002_v58 = vld [vmem:[%s5315_s4 + $0x3] ss:$0 sm:$0xff]  ;;  %v5020_v1 = vld [vmem:[%s5317_s6] ss:$0 sm:$0xff] }
  0x1b   :  { %4057 = vmatmul.mubr.msk.f32.vlgmr.msra.gmra.mrb[4].mxu0 %vm123_vm1, %v4708_v18  ;;  %v5025_v5 = vld [vmem:[%s5317_s6 + $0x1] ss:$0 sm:$0xff] }
  0x1c   :  { %4068 = vmatmul.mubr.msk.f32.vlgmr.msra.gmra.mrb[4].mxu1 %vm123_vm1, %v4708_v18  ;;  %4426 = vmatpush3.bf16.msra.mxu0 %v4806_v43 }
  0x1d   :  { %4432 = vmatpush3.bf16.msra.mxu1 %v4810_v44  ;;  %4427 = vmatprep.subr.bf16.mxu0 %v4594_v3 }
  0x1e   :  { %4433 = vmatprep.subr.bf16.mxu1 %v4594_v3  ;;  %4078 = vmatprep.mubr.msk.f32.mxu0 %vm4595_vm0, %v4596_v11 }
  0x1f   :  { %4089 = vmatprep.mubr.msk.f32.mxu1 %vm4595_vm0, %v4596_v11 }
  0x20   :  { %4429 = vmatpush3.bf16.msra.mxu0 %v4830_v49 }
  0x21   :  { %4435 = vmatpush3.bf16.msra.mxu1 %v4834_v50  ;;  %4436 = vmatprep.subr.bf16.mxu0 %v4594_v3 }
  0x22   :  { %4442 = vmatprep.subr.bf16.mxu1 %v4594_v3 }
  0x23   :  { %4079 = vmatmul.mubr.msk.f32.vlgmr.msra.gmra.mrb[6].mxu0 %vm123_vm1, %v4708_v18 }
  0x24   :  { %4090 = vmatmul.mubr.msk.f32.vlgmr.msra.gmra.mrb[6].mxu1 %vm123_vm1, %v4708_v18  ;;  %4438 = vmatpush3.bf16.msra.mxu0 %v4854_v55 }
  0x25   :  { %4444 = vmatpush3.bf16.msra.mxu1 %v4858_v56  ;;  %4439 = vmatprep.subr.bf16.mxu0 %v4594_v3 }
  0x26   :  { %4445 = vmatprep.subr.bf16.mxu1 %v4594_v3  ;;  %4100 = vmatprep.mubr.msk.f32.mxu0 %vm4595_vm0, %v4596_v11 }
  0x27   :  { %4111 = vmatprep.mubr.msk.f32.mxu1 %vm4595_vm0, %v4596_v11 }
  0x28   :  { %4441 = vmatpush3.bf16.msra.mxu0 %v4882_v60 }
  0x29   :  { %4447 = vmatpush3.bf16.msra.mxu1 %v4887_v62  ;;  %4448 = vmatprep.subr.bf16.mxu0 %v4594_v3 }
  0x2a   :  { %4454 = vmatprep.subr.bf16.mxu1 %v4594_v3 }
  0x2b   :  { %4101 = vmatmul.mubr.msk.f32.vlgmr.msra.gmra.mrb[8].mxu0 %vm123_vm1, %v4708_v18 }
  0x2c   :  { %4112 = vmatmul.mubr.msk.f32.vlgmr.msra.gmra.mrb[8].mxu1 %vm123_vm1, %v4708_v18  ;;  %4450 = vmatpush3.bf16.msra.mxu0 %v4899_v2 }
  0x2d   :  { %4456 = vmatpush3.bf16.msra.mxu1 %v4906_v6  ;;  %4451 = vmatprep.subr.bf16.mxu0 %v4594_v3 }
  0x2e   :  { %4457 = vmatprep.subr.bf16.mxu1 %v4594_v3  ;;  %4122 = vmatprep.mubr.msk.f32.mxu0 %vm4595_vm0, %v4596_v11 }
  0x2f   :  { %4133 = vmatprep.mubr.msk.f32.mxu1 %vm4595_vm0, %v4596_v11 }
  0x30   :  { %4453 = vmatpush3.bf16.msra.mxu0 %v4926_v14 }
  0x31   :  { %4459 = vmatpush3.bf16.msra.mxu1 %v4933_v16  ;;  %4136 = vmatprep.subr.mxu0 %v4596_v11 }
  0x32   :  { %4141 = vmatprep.subr.mxu1 %v4596_v11 }
  0x33   :  { %4123 = vmatmul.mubr.msk.f32.vlgmr.msra.gmra.mrb[10].mxu0 %vm123_vm1, %v4708_v18 }
  0x34   :  { %4134 = vmatmul.mubr.msk.f32.vlgmr.msra.gmra.mrb[10].mxu1 %vm123_vm1, %v4708_v18  ;;  %4138 = vmatprep.mubr.msk.f32.mxu0 %vm4595_vm0, %v4596_v11  ;;  %v4957_v18 = vld [vmem:[%s5316_s5 + $0x1] ss:$0 sm:$0xff] }
  0x35   :  { %4143 = vmatprep.mubr.msk.f32.mxu1 %vm4595_vm0, %v4596_v11 }
  0xde   :  { %v193_v17 = vpop.f32.mrb[0].mxu0 }
  0xdf   :  { %v4014_v21 = vpop.f32.mrb[1].mxu0  ;;  %v263_v22 = vpop.f32.mrb[0].mxu1  ;;  %v194_v45 = vadd.f32 %v4962_v34, %v193_v17 }
  0xe0   :  { %v4025_v23 = vpop.f32.mrb[1].mxu1  ;;  %v264_v46 = vadd.f32 %v4968_v40, %v263_v22 }
  0xe6   :  { %v333_v24 = vpop.f32.mrb[2].mxu0 }
  0xe7   :  { %v4036_v27 = vpop.f32.mrb[3].mxu0  ;;  %v403_v28 = vpop.f32.mrb[2].mxu1  ;;  %v334_v63 = vadd.f32 %v4996_v52, %v333_v24 }
  0xe8   :  { %v4047_v29 = vpop.f32.mrb[3].mxu1  ;;  %v404_v0 = vadd.f32 %v5002_v58, %v403_v28 }
  0xee   :  { %v497_v33 = vpop.f32.mrb[4].mxu0 }
  0xef   :  { %v498_v35 = vadd.f32 %v4952_v30, %v497_v33  ;;  %v567_v36 = vpop.f32.mrb[4].mxu1  ;;  %v4058_v39 = vpop.f32.mrb[5].mxu0 }
  0xf0   :  { %v568_v41 = vadd.f32 %v4957_v18, %v567_v36  ;;  %v4069_v42 = vpop.f32.mrb[5].mxu1 }
  0xf1   :  { %4137 = vmatpush3.xpose.msk.msra.mxu0 %vm1015_vm2, %v498_v35 }
  0xf2   :  { %4142 = vmatpush3.xpose.msk.msra.mxu1 %vm1015_vm2, %v568_v41  ;;  %4146 = vmatprep.subr.mxu0 %v4596_v11 }
  0xf3   :  { %4151 = vmatprep.subr.mxu1 %v4596_v11 }
  0xf4   :  { %4139 = vmatmul.mubr.msk.f32.vlgmr.msra.gmra.mrb[12].mxu0 %vm1015_vm2, %v194_v45 }
  0xf5   :  { %4144 = vmatmul.mubr.msk.f32.vlgmr.msra.gmra.mrb[12].mxu1 %vm1015_vm2, %v264_v46  ;;  %4148 = vmatprep.mubr.msk.f32.mxu0 %vm4595_vm0, %v4596_v11 }
  0xf6   :  { %v637_v51 = vpop.f32.mrb[6].mxu0  ;;  %4153 = vmatprep.mubr.msk.f32.mxu1 %vm4595_vm0, %v4596_v11 }
  0xf7   :  { %v638_v53 = vadd.f32 %v4981_v47, %v637_v51  ;;  %v707_v54 = vpop.f32.mrb[6].mxu1  ;;  %v4080_v57 = vpop.f32.mrb[7].mxu0 }
  0xf8   :  { %v708_v59 = vadd.f32 %v4987_v48, %v707_v54  ;;  %v4091_v61 = vpop.f32.mrb[7].mxu1 }
  0xf9   :  { %4147 = vmatpush3.xpose.msk.msra.mxu0 %vm1015_vm2, %v638_v53 }
  0xfa   :  { %4152 = vmatpush3.xpose.msk.msra.mxu1 %vm1015_vm2, %v708_v59  ;;  %4156 = vmatprep.subr.mxu0 %v4596_v11 }
  0xfb   :  { %4161 = vmatprep.subr.mxu1 %v4596_v11 }
  0xfc   :  { %4149 = vmatmul.mubr.msk.f32.vlgmr.msra.gmra.mrb[14].mxu0 %vm1015_vm2, %v334_v63 }
  0xfd   :  { %4154 = vmatmul.mubr.msk.f32.vlgmr.msra.gmra.mrb[14].mxu1 %vm1015_vm2, %v404_v0  ;;  %4158 = vmatprep.mubr.msk.f32.mxu0 %vm4595_vm0, %v4596_v11 }
  0xfe   :  { %4163 = vmatprep.mubr.msk.f32.mxu1 %vm4595_vm0, %v4596_v11  ;;  %v801_v7 = vpop.f32.mrb[8].mxu0 }
  0xff   :  { %v802_v9 = vadd.f32 %v5020_v1, %v801_v7  ;;  %v4102_v10 = vpop.f32.mrb[9].mxu0  ;;  %v871_v15 = vpop.f32.mrb[8].mxu1 }
 0x100   :  { %v872_v17 = vadd.f32 %v5025_v5, %v871_v15  ;;  %v4113_v21 = vpop.f32.mrb[9].mxu1 }
 0x101   :  { %4157 = vmatpush3.msra.mxu0 %v802_v9 }
 0x102   :  { %4162 = vmatpush3.msra.mxu1 %v872_v17  ;;  %4166 = vmatprep.subr.mxu0 %v4596_v11 }
 0x103   :  { %4171 = vmatprep.subr.mxu1 %v4596_v11 }
 0x106   :  { %v941_v22 = vpop.f32.mrb[10].mxu0 }
 0x107   :  { %v5031_v23 = vpop.f32.mrb[10].mxu1  ;;  %v4124_v24 = vpop.f32.mrb[11].mxu0 }
 0x108   :  { %v4135_v27 = vpop.f32.mrb[11].mxu1 }
 0x1c7   :  { %v1088_v28 = vpop.f32.mrb[12].mxu0 }
 0x1c8   :  { %v1164_v29 = vpop.f32.mrb[12].mxu1  ;;  %v4140_v33 = vpop.f32.mrb[13].mxu0  ;;  %v1320_v35 = vsel %vm1015_vm2, %v1088_v28, -inf }
 0x1c9   :  { %v4145_v36 = vpop.f32.mrb[13].mxu1  ;;  %1321 = vmax.xlane.f32.xlu0 %v1320_v35  ;;  %v1323_v39 = vsel %vm1015_vm2, %v1164_v29, -inf }
 0x1cd   :  { %1324 = vmax.xlane.f32.xlu0 %v1323_v39 }
 0x1cf   :  { %v1240_v41 = vpop.f32.mrb[14].mxu0 }
 0x1d0   :  { %v1316_v42 = vpop.f32.mrb[14].mxu1  ;;  %v4150_v45 = vpop.f32.mrb[15].mxu0  ;;  %v1326_v46 = vsel %vm1015_vm2, %v1240_v41, -inf }
 0x1d1   :  { %v4155_v51 = vpop.f32.mrb[15].mxu1  ;;  %1327 = vmax.xlane.f32.xlu1 %v1326_v46  ;;  %v1329_v53 = vsel %vm1015_vm2, %v1316_v42, -inf  ;;  %v5044_v46 = vld [vmem:[%s5317_s6 + $0x2] ss:$0 sm:$0xff] }
 0x1d5   :  { %1330 = vmax.xlane.f32.xlu1 %v1329_v53 }
 0x256   :  { %v1322_v54 = vpop.xlane.xlu0 %1321 }
 0x257   :  { %v1332_v57 = vsub.f32 %v1088_v28, %v1322_v54 }
 0x259   :  { %v1336_v59 = vmul.f32 1.442695, %v1332_v57  ;;  %v942_v57 = vadd.f32 %v5044_v46, %v941_v22 }
 0x25a   :  { %v1325_v61 = vpop.xlane.xlu0 %1324 }
 0x25b   :  { %4538 = vpow2.f32 %v1336_v59  ;;  %v1333_v63 = vsub.f32 %v1164_v29, %v1325_v61  ;;  %v5050_v59 = vld [vmem:[%s5317_s6 + $0x3] ss:$0 sm:$0xff] }
 0x25d   :  { %v1338_v0 = vmul.f32 1.442695, %v1333_v63 }
 0x25e   :  { %v1328_v7 = vpop.xlane.xlu1 %1327 }
 0x25f   :  { %4540 = vpow2.f32 %v1338_v0  ;;  %v1334_v9 = vsub.f32 %v1240_v41, %v1328_v7  ;;  %v1012_v0 = vadd.f32 %v5050_v59, %v5031_v23  ;;  %v5071_v23 = vld [vmem:[%s5318_s7] sm:$0xff] }
 0x261   :  { %v1340_v10 = vmul.f32 1.442695, %v1334_v9 }
 0x262   :  { %v1331_v15 = vpop.xlane.xlu1 %1330 }
 0x263   :  { %4542 = vpow2.f32 %v1340_v10  ;;  %v1335_v17 = vsub.f32 %v1316_v42, %v1331_v15  ;;  %v5078_v15 = vld [vmem:[%s5318_s7 + $0x8] sm:$0xff] }
 0x265   :  { %v4539_v21 = vpop.eup %4538  ;;  %v1342_v24 = vmul.f32 1.442695, %v1335_v17  ;;  %v5085_v17 = vld [vmem:[%s5318_s7 + $0x10] sm:$0xff] }
 0x266   :  { %v1344_v27 = vsel %vm1015_vm2, %v4539_v21, 0.0 }
 0x267   :  { %4544 = vpow2.f32 %v1342_v24  ;;  %1345 = vadd.xlane.f32.xlu0 %v1344_v27  ;;  %v5095_v27 = vld [vmem:[%s5318_s7 + $0x18] sm:$0xff] }
 0x269   :  { %v4541_v33 = vpop.eup %4540 }
 0x26a   :  { %v1347_v28 = vsel %vm1015_vm2, %v4541_v33, 0.0 }
 0x26b   :  { %1348 = vadd.xlane.f32.xlu1 %v1347_v28 }
 0x26d   :  { %v4543_v35 = vpop.eup %4542 }
 0x26e   :  { %v1350_v29 = vsel %vm1015_vm2, %v4543_v35, 0.0 }
 0x26f   :  { %1351 = vadd.xlane.f32.xlu0 %v1350_v29 }
 0x271   :  { %v4545_v36 = vpop.eup %4544 }
 0x272   :  { %v1353_v39 = vsel %vm1015_vm2, %v4545_v36, 0.0 }
 0x273   :  { %1354 = vadd.xlane.f32.xlu1 %v1353_v39 }
 0x2f4   :  { %v1346_v41 = vpop.xlane.xlu0 %1345 }
 0x2f5   :  { %4546 = vrcp.f32 %v1346_v41  ;;  %v5113_v41 = vld [vmem:[%s5311_s0 + $0x8] sm:$0xff] }
 0x2f8   :  { %v1349_v42 = vpop.xlane.xlu1 %1348 }
 0x2f9   :  { %4548 = vrcp.f32 %v1349_v42 }
 0x2fc   :  { %v1352_v45 = vpop.xlane.xlu0 %1351 }
 0x2fd   :  { %4550 = vrcp.f32 %v1352_v45 }
 0x2ff   :  { %v4547_v51 = vpop.eup %4546 }
 0x300   :  { %v1360_v53 = vmul.f32 %v4547_v51, %v4539_v21  ;;  %v1355_v54 = vpop.xlane.xlu1 %1354 }
 0x301   :  { %4552 = vrcp.f32 %v1355_v54 }
 0x302   :  { %4159 = vmatmul.mubr.msk.f32.vlgmr.msra.gmra.mrb[16].mxu0 %vm1015_vm2, %v1360_v53 }
 0x303   :  { %v4549_v61 = vpop.eup %4548  ;;  %4167 = vmatpush3.msra.mxu0 %v942_v57  ;;  %4168 = vmatprep.mubr.msk.f32.mxu0 %vm4595_vm0, %v4596_v11 }
 0x304   :  { %v1361_v63 = vmul.f32 %v4549_v61, %v4541_v33  ;;  %4176 = vmatprep.subr.mxu0 %v4596_v11 }
 0x306   :  { %4164 = vmatmul.mubr.msk.f32.vlgmr.msra.gmra.mrb[16].mxu1 %vm1015_vm2, %v1361_v63 }
 0x307   :  { %v4551_v22 = vpop.eup %4550  ;;  %4172 = vmatpush3.msra.mxu1 %v1012_v0  ;;  %4173 = vmatprep.mubr.msk.f32.mxu1 %vm4595_vm0, %v4596_v11 }
 0x308   :  { %v1362_v7 = vmul.f32 %v4551_v22, %v4543_v35  ;;  %4181 = vmatprep.subr.mxu1 %v4596_v11 }
 0x30a   :  { %4169 = vmatmul.mubr.msk.f32.vlgmr.msra.gmra.mrb[18].mxu0 %vm1015_vm2, %v1362_v7 }
 0x30b   :  { %v4553_v9 = vpop.eup %4552  ;;  %4178 = vmatprep.mubr.msk.f32.mxu0 %vm4595_vm0, %v4596_v11  ;;  %4177 = vmatpush3.msra.mxu0 %v5071_v23 }
 0x30c   :  { %v1363_v10 = vmul.f32 %v4553_v9, %v4545_v36  ;;  %4186 = vmatprep.subr.mxu0 %v4596_v11 }
 0x30e   :  { %4174 = vmatmul.mubr.msk.f32.vlgmr.msra.gmra.mrb[18].mxu1 %vm1015_vm2, %v1363_v10 }
 0x30f   :  { %4183 = vmatprep.mubr.msk.f32.mxu1 %vm4595_vm0, %v4596_v11  ;;  %4182 = vmatpush3.msra.mxu1 %v5078_v15 }
 0x310   :  { %4191 = vmatprep.subr.mxu1 %v4596_v11 }
 0x3d5   :  { %v1433_v21 = vpop.f32.mrb[16].mxu0 }
 0x3d6   :  { %v4160_v24 = vpop.f32.mrb[17].mxu0  ;;  %4179 = vmatmul.mubr.msk.f32.vlgmr.msra.gmra.mrb[20].mxu0 %vm1015_vm2, %v1433_v21 }
 0x3d7   :  { %4187 = vmatpush3.msra.mxu0 %v5085_v17  ;;  %4188 = vmatprep.mubr.msk.f32.mxu0 %vm4595_vm0, %v4596_v11 }
 0x3d8   :  { %4460 = vmatprep.subr.bf16.mxu0 %v4594_v3 }
 0x3d9   :  { %v1506_v33 = vpop.f32.mrb[16].mxu1 }
 0x3da   :  { %v4165_v28 = vpop.f32.mrb[17].mxu1  ;;  %4184 = vmatmul.mubr.msk.f32.vlgmr.msra.gmra.mrb[20].mxu1 %vm1015_vm2, %v1506_v33 }
 0x3db   :  { %4192 = vmatpush3.msra.mxu1 %v5095_v27  ;;  %4193 = vmatprep.mubr.msk.f32.mxu1 %vm4595_vm0, %v4596_v11 }
 0x3dc   :  { %4466 = vmatprep.subr.bf16.mxu1 %v4594_v3 }
 0x3dd   :  { %v1579_v35 = vpop.f32.mrb[18].mxu0 }
 0x3de   :  { %v4170_v29 = vpop.f32.mrb[19].mxu0  ;;  %4189 = vmatmul.mubr.msk.f32.vlgmr.msra.gmra.mrb[22].mxu0 %vm1015_vm2, %v1579_v35 }
 0x3df   :  { %4462 = vmatpush3.bf16.msra.mxu0 %v4661_v4  ;;  %4204 = vmatprep.mubr.msk.f32.mxu0 %vm4595_vm0, %v4596_v11 }
 0x3e0   :  { %4463 = vmatprep.subr.bf16.mxu0 %v4594_v3 }
 0x3e1   :  { %v1652_v36 = vpop.f32.mrb[18].mxu1 }
 0x3e2   :  { %v4175_v39 = vpop.f32.mrb[19].mxu1  ;;  %4194 = vmatmul.mubr.msk.f32.vlgmr.msra.gmra.mrb[22].mxu1 %vm1015_vm2, %v1652_v36 }
 0x3e3   :  { %4465 = vmatpush3.bf16.msra.mxu0 %v4685_v12  ;;  %4468 = vmatpush3.bf16.msra.mxu1 %v4672_v8 }
 0x3e4   :  { %4469 = vmatprep.subr.bf16.mxu1 %v4594_v3  ;;  %4472 = vmatprep.subr.bf16.mxu0 %v4594_v3 }
 0x3e5   :  { %4215 = vmatprep.mubr.msk.f32.mxu1 %vm4595_vm0, %v4596_v11 }
 0x3e6   :  { %4205 = vmatmul.mubr.msk.f32.vlgmr.msra.gmra.mrb[24].mxu0 %vm123_vm1, %v5113_v41 }
 0x3e7   :  { %4471 = vmatpush3.bf16.msra.mxu1 %v4689_v13  ;;  %4474 = vmatpush3.bf16.msra.mxu0 %v4710_v19 }
 0x3e8   :  { %4475 = vmatprep.subr.bf16.mxu0 %v4594_v3  ;;  %4478 = vmatprep.subr.bf16.mxu1 %v4594_v3 }
 0x3e9   :  { %4226 = vmatprep.mubr.msk.f32.mxu0 %vm4595_vm0, %v4596_v11 }
 0x3ea   :  { %4216 = vmatmul.mubr.msk.f32.vlgmr.msra.gmra.mrb[24].mxu1 %vm123_vm1, %v5113_v41 }
 0x3eb   :  { %4477 = vmatpush3.bf16.msra.mxu0 %v4734_v25  ;;  %4480 = vmatpush3.bf16.msra.mxu1 %v4714_v20 }
 0x3ec   :  { %4481 = vmatprep.subr.bf16.mxu1 %v4594_v3  ;;  %4484 = vmatprep.subr.bf16.mxu0 %v4594_v3 }
 0x3ed   :  { %4237 = vmatprep.mubr.msk.f32.mxu1 %vm4595_vm0, %v4596_v11 }
 0x3ee   :  { %4227 = vmatmul.mubr.msk.f32.vlgmr.msra.gmra.mrb[26].mxu0 %vm123_vm1, %v5113_v41 }
 0x3ef   :  { %4483 = vmatpush3.bf16.msra.mxu1 %v4738_v26  ;;  %4486 = vmatpush3.bf16.msra.mxu0 %v4758_v31 }
 0x3f0   :  { %4487 = vmatprep.subr.bf16.mxu0 %v4594_v3  ;;  %4490 = vmatprep.subr.bf16.mxu1 %v4594_v3 }
 0x3f1   :  { %4248 = vmatprep.mubr.msk.f32.mxu0 %vm4595_vm0, %v4596_v11 }
 0x3f2   :  { %4238 = vmatmul.mubr.msk.f32.vlgmr.msra.gmra.mrb[26].mxu1 %vm123_vm1, %v5113_v41 }
 0x3f3   :  { %4489 = vmatpush3.bf16.msra.mxu0 %v4782_v37  ;;  %4492 = vmatpush3.bf16.msra.mxu1 %v4762_v32 }
 0x3f4   :  { %4493 = vmatprep.subr.bf16.mxu1 %v4594_v3  ;;  %4496 = vmatprep.subr.bf16.mxu0 %v4594_v3 }
 0x3f5   :  { %4259 = vmatprep.mubr.msk.f32.mxu1 %vm4595_vm0, %v4596_v11 }
 0x3f6   :  { %4249 = vmatmul.mubr.msk.f32.vlgmr.msra.gmra.mrb[28].mxu0 %vm123_vm1, %v5113_v41 }
 0x3f7   :  { %4495 = vmatpush3.bf16.msra.mxu1 %v4786_v38  ;;  %4498 = vmatpush3.bf16.msra.mxu0 %v4806_v43  ;;  %v5215_v38 = vld [vmem:[%s5319_s8] ss:$0 sm:$0xff]  ;;  %s4597_s8 = smov [#allocation2]  }
 0x3f8   :  { %4499 = vmatprep.subr.bf16.mxu0 %v4594_v3  ;;  %4502 = vmatprep.subr.bf16.mxu1 %v4594_v3  ;;  %s3755_s1 = sshll.u32 %s4597_s8, 4  ;;  %s3756_s1 = int_to_ptr.vmem [resolvable:$true] %s3755_s1 }
 0x3f9   :  { %4270 = vmatprep.mubr.msk.f32.mxu0 %vm4595_vm0, %v4596_v11  ;;  %s4570_s24 = scalar_lea.vmem %s3756_s1, 256  ;;  %p4575_p1 = scmp.lt.s32.totalorder %s3756_s1, %s3756_s1 }
 0x3fa   :  { %4260 = vmatmul.mubr.msk.f32.vlgmr.msra.gmra.mrb[28].mxu1 %vm123_vm1, %v5113_v41  ;;  %p4571_p0 = scmp.ne.s32.totalorder %s3756_s1, %s4570_s24  ;;  %p4576_p2 = scmp.lt.s32.totalorder %s4570_s24, %s4570_s24 }
 0x3fb   :  { %4501 = vmatpush3.bf16.msra.mxu0 %v4830_v49  ;;  %4504 = vmatpush3.bf16.msra.mxu1 %v4810_v44 }
 0x3fc   :  { %4505 = vmatprep.subr.bf16.mxu1 %v4594_v3  ;;  %4281 = vmatprep.mubr.msk.f32.mxu1 %vm4595_vm0, %v4596_v11  ;;  %p4577_p3 = por %p4576_p2, %p4575_p1 }
 0x3fd   :  { %4508 = vmatprep.subr.bf16.mxu0 %v4594_v3 }
 0x3fe   :  { %4271 = vmatmul.mubr.msk.f32.vlgmr.msra.gmra.mrb[30].mxu0 %vm123_vm1, %v5113_v41  ;;  %p4578_p4 = pnand %p4577_p3, %p4571_p0 }
 0x3ff   :  { %4507 = vmatpush3.bf16.msra.mxu1 %v4834_v50  ;;  %4510 = vmatpush3.bf16.msra.mxu0 %v4854_v55 }
 0x400   :  { %4511 = vmatprep.subr.bf16.mxu0 %v4594_v3  ;;  %4514 = vmatprep.subr.bf16.mxu1 %v4594_v3 }
 0x401   :  { %4292 = vmatprep.mubr.msk.f32.mxu0 %vm4595_vm0, %v4596_v11 }
 0x402   :  { %4282 = vmatmul.mubr.msk.f32.vlgmr.msra.gmra.mrb[30].mxu1 %vm123_vm1, %v5113_v41 }
 0x403   :  { %4513 = vmatpush3.bf16.msra.mxu0 %v4882_v60  ;;  %4516 = vmatpush3.bf16.msra.mxu1 %v4858_v56 }
 0x404   :  { %4517 = vmatprep.subr.bf16.mxu1 %v4594_v3  ;;  %4520 = vmatprep.subr.bf16.mxu0 %v4594_v3 }
 0x405   :  { %4303 = vmatprep.mubr.msk.f32.mxu1 %vm4595_vm0, %v4596_v11 }
 0x406   :  { %4293 = vmatmul.mubr.msk.f32.vlgmr.msra.gmra.mrb[32].mxu0 %vm123_vm1, %v5113_v41 }
 0x407   :  { %4519 = vmatpush3.bf16.msra.mxu1 %v4887_v62  ;;  %4522 = vmatpush3.bf16.msra.mxu0 %v4899_v2 }
 0x408   :  { %4523 = vmatprep.subr.bf16.mxu0 %v4594_v3  ;;  %4526 = vmatprep.subr.bf16.mxu1 %v4594_v3 }
 0x409   :  { %4314 = vmatprep.mubr.msk.f32.mxu0 %vm4595_vm0, %v4596_v11 }
 0x40a   :  { %4304 = vmatmul.mubr.msk.f32.vlgmr.msra.gmra.mrb[32].mxu1 %vm123_vm1, %v5113_v41 }
 0x40b   :  { %4525 = vmatpush3.bf16.msra.mxu0 %v4926_v14  ;;  %4528 = vmatpush3.bf16.msra.mxu1 %v4906_v6 }
 0x40c   :  { %4529 = vmatprep.subr.bf16.mxu1 %v4594_v3  ;;  %4328 = vmatprep.subr.mxu0 %v4596_v11 }
 0x40d   :  { %4325 = vmatprep.mubr.msk.f32.mxu1 %vm4595_vm0, %v4596_v11 }
 0x40e   :  { %4315 = vmatmul.mubr.msk.f32.vlgmr.msra.gmra.mrb[34].mxu0 %vm123_vm1, %v5113_v41 }
 0x40f   :  { %4531 = vmatpush3.bf16.msra.mxu1 %v4933_v16  ;;  %4330 = vmatprep.mubr.msk.f32.mxu0 %vm4595_vm0, %v4596_v11 }
 0x410   :  { %4333 = vmatprep.subr.mxu1 %v4596_v11 }
 0x412   :  { %4326 = vmatmul.mubr.msk.f32.vlgmr.msra.gmra.mrb[34].mxu1 %vm123_vm1, %v5113_v41 }
 0x413   :  { %4335 = vmatprep.mubr.msk.f32.mxu1 %vm4595_vm0, %v4596_v11 }
 0x4a9   :  { %v1725_v3 = vpop.f32.mrb[20].mxu0 }
 0x4aa   :  { %v4180_v4 = vpop.f32.mrb[21].mxu0  ;;  %v1948_v12 = vsel %vm123_vm1, %v1725_v3, 0.0 }
 0x4ad   :  { %v1798_v8 = vpop.f32.mrb[20].mxu1 }
 0x4ae   :  { %v1949_v13 = vsel %vm123_vm1, %v1798_v8, 0.0  ;;  %v4185_v19 = vpop.f32.mrb[21].mxu1 }
 0x4af   :  { %v1950_v20 = vadd.f32 %v1949_v13, %v1948_v12 }
 0x4b1   :  { %v1871_v25 = vpop.f32.mrb[22].mxu0 }
 0x4b2   :  { %v1951_v26 = vsel %vm123_vm1, %v1871_v25, 0.0  ;;  %v4190_v31 = vpop.f32.mrb[23].mxu0 }
 0x4b3   :  { %v1952_v32 = vadd.f32 %v1951_v26, %v1950_v20 }
 0x4b5   :  { %v1944_v37 = vpop.f32.mrb[22].mxu1 }
 0x4b6   :  { %v1953_v43 = vsel %vm123_vm1, %v1944_v37, 0.0  ;;  %v4195_v44 = vpop.f32.mrb[23].mxu1 }
 0x4b7   :  { %v1954_v49 = vadd.f32 %v1953_v43, %v1952_v32 }
 0x4b9   :  { %v1961_v50 = vadd.f32 %v5215_v38, %v1954_v49  ;;  %v2034_v55 = vpop.f32.mrb[24].mxu0 }
 0x4ba   :  { %v4206_v56 = vpop.f32.mrb[25].mxu0  ;;  %v2035_v53 = vadd.f32 %v4962_v34, %v2034_v55 }
 0x4bb   :  { %1962 = vst.msk [vmem:[#allocation2] sm:$0xff] %vm123_vm1, %v1961_v50 }
 0x4bd   :  { %v2104_v60 = vpop.f32.mrb[24].mxu1 }
 0x4be   :  { %v4217_v62 = vpop.f32.mrb[25].mxu1 }
 0x4c1   :  { %v2174_v2 = vpop.f32.mrb[26].mxu0 }
 0x4c2   :  { %v4228_v6 = vpop.f32.mrb[27].mxu0 }
 0x4c5   :  { %v2244_v14 = vpop.f32.mrb[26].mxu1 }
 0x4c6   :  { %v4239_v16 = vpop.f32.mrb[27].mxu1 }
 0x4c9   :  { %v2314_v42 = vpop.f32.mrb[28].mxu0 }
 0x4ca   :  { %v2315_v45 = vadd.f32 %v4952_v30, %v2314_v42  ;;  %v4250_v51 = vpop.f32.mrb[29].mxu0  ;;  %v2105_v30 = vadd.f32 %v4968_v40, %v2104_v60 }
 0x4cc   :  { %4329 = vmatpush3.xpose.msk.msra.mxu0 %vm1015_vm2, %v2315_v45 }
 0x4cd   :  { %v2384_v54 = vpop.f32.mrb[28].mxu1  ;;  %4338 = vmatprep.subr.mxu0 %v4596_v11 }
 0x4ce   :  { %v2385_v57 = vadd.f32 %v4957_v18, %v2384_v54  ;;  %v4261_v61 = vpop.f32.mrb[29].mxu1  ;;  %v2175_v18 = vadd.f32 %v4996_v52, %v2174_v2 }
 0x4cf   :  { %4331 = vmatmul.mubr.msk.f32.vlgmr.msra.gmra.mrb[36].mxu0 %vm1015_vm2, %v2035_v53 }
 0x4d0   :  { %4334 = vmatpush3.xpose.msk.msra.mxu1 %vm1015_vm2, %v2385_v57  ;;  %4340 = vmatprep.mubr.msk.f32.mxu0 %vm4595_vm0, %v4596_v11 }
 0x4d1   :  { %v2454_v63 = vpop.f32.mrb[30].mxu0  ;;  %4343 = vmatprep.subr.mxu1 %v4596_v11 }
 0x4d2   :  { %v2455_v34 = vadd.f32 %v4981_v47, %v2454_v63  ;;  %v4272_v0 = vpop.f32.mrb[31].mxu0  ;;  %v2245_v47 = vadd.f32 %v5002_v58, %v2244_v14 }
 0x4d3   :  { %4336 = vmatmul.mubr.msk.f32.vlgmr.msra.gmra.mrb[36].mxu1 %vm1015_vm2, %v2105_v30 }
 0x4d4   :  { %4339 = vmatpush3.xpose.msk.msra.mxu0 %vm1015_vm2, %v2455_v34  ;;  %4345 = vmatprep.mubr.msk.f32.mxu1 %vm4595_vm0, %v4596_v11 }
 0x4d5   :  { %v2524_v22 = vpop.f32.mrb[30].mxu1  ;;  %4348 = vmatprep.subr.mxu0 %v4596_v11 }
 0x4d6   :  { %v2525_v40 = vadd.f32 %v4987_v48, %v2524_v22  ;;  %v4283_v7 = vpop.f32.mrb[31].mxu1 }
 0x4d7   :  { %4341 = vmatmul.mubr.msk.f32.vlgmr.msra.gmra.mrb[38].mxu0 %vm1015_vm2, %v2175_v18 }
 0x4d8   :  { %4344 = vmatpush3.xpose.msk.msra.mxu1 %vm1015_vm2, %v2525_v40  ;;  %4350 = vmatprep.mubr.msk.f32.mxu0 %vm4595_vm0, %v4596_v11 }
 0x4d9   :  { %v2594_v9 = vpop.f32.mrb[32].mxu0  ;;  %4353 = vmatprep.subr.mxu1 %v4596_v11 }
 0x4da   :  { %v2595_v52 = vadd.f32 %v5020_v1, %v2594_v9  ;;  %v4294_v10 = vpop.f32.mrb[33].mxu0 }
 0x4db   :  { %4346 = vmatmul.mubr.msk.f32.vlgmr.msra.gmra.mrb[38].mxu1 %vm1015_vm2, %v2245_v47 }
 0x4dc   :  { %4349 = vmatpush3.msra.mxu0 %v2595_v52  ;;  %4355 = vmatprep.mubr.msk.f32.mxu1 %vm4595_vm0, %v4596_v11 }
 0x4dd   :  { %v2664_v48 = vpop.f32.mrb[32].mxu1  ;;  %4358 = vmatprep.subr.mxu0 %v4596_v11 }
 0x4de   :  { %v2665_v21 = vadd.f32 %v5025_v5, %v2664_v48  ;;  %v4305_v24 = vpop.f32.mrb[33].mxu1 }
 0x4e0   :  { %4354 = vmatpush3.msra.mxu1 %v2665_v21 }
 0x4e1   :  { %v2734_v58 = vpop.f32.mrb[34].mxu0  ;;  %4363 = vmatprep.subr.mxu1 %v4596_v11 }
 0x4e2   :  { %v4316_v33 = vpop.f32.mrb[35].mxu0  ;;  %v2735_v63 = vadd.f32 %v5044_v46, %v2734_v58 }
 0x4e5   :  { %v5252_v28 = vpop.f32.mrb[34].mxu1 }
 0x4e6   :  { %v4327_v1 = vpop.f32.mrb[35].mxu1  ;;  %v2805_v18 = vadd.f32 %v5050_v59, %v5252_v28 }
 0x5a2   :  { %v2880_v35 = vpop.f32.mrb[36].mxu0 }
 0x5a3   :  { %v4332_v29 = vpop.f32.mrb[37].mxu0  ;;  %v3112_v36 = vsel %vm1015_vm2, %v2880_v35, -inf }
 0x5a4   :  { %3113 = vmax.xlane.f32.xlu0 %v3112_v36 }
 0x5a6   :  { %v2956_v39 = vpop.f32.mrb[36].mxu1 }
 0x5a7   :  { %v4337_v41 = vpop.f32.mrb[37].mxu1  ;;  %v3115_v3 = vsel %vm1015_vm2, %v2956_v39, -inf }
 0x5a8   :  { %3116 = vmax.xlane.f32.xlu1 %v3115_v3 }
 0x5aa   :  { %v3032_v5 = vpop.f32.mrb[38].mxu0 }
 0x5ab   :  { %v4342_v4 = vpop.f32.mrb[39].mxu0  ;;  %v3118_v8 = vsel %vm1015_vm2, %v3032_v5, -inf }
 0x5ac   :  { %3119 = vmax.xlane.f32.xlu0 %v3118_v8 }
 0x5ae   :  { %v3108_v12 = vpop.f32.mrb[38].mxu1 }
 0x5af   :  { %v4347_v13 = vpop.f32.mrb[39].mxu1  ;;  %v3121_v19 = vsel %vm1015_vm2, %v3108_v12, -inf }
 0x5b0   :  { %3122 = vmax.xlane.f32.xlu1 %v3121_v19 }
 0x631   :  { %v3114_v20 = vpop.xlane.xlu0 %3113 }
 0x632   :  { %v3124_v25 = vsub.f32 %v2880_v35, %v3114_v20 }
 0x634   :  { %v3128_v26 = vmul.f32 1.442695, %v3124_v25 }
 0x635   :  { %v3117_v31 = vpop.xlane.xlu1 %3116 }
 0x636   :  { %4554 = vpow2.f32 %v3128_v26  ;;  %v3125_v32 = vsub.f32 %v2956_v39, %v3117_v31 }
 0x638   :  { %v3130_v37 = vmul.f32 1.442695, %v3125_v32 }
 0x639   :  { %v3120_v43 = vpop.xlane.xlu0 %3119 }
 0x63a   :  { %4556 = vpow2.f32 %v3130_v37  ;;  %v3126_v44 = vsub.f32 %v3032_v5, %v3120_v43 }
 0x63c   :  { %v3132_v49 = vmul.f32 1.442695, %v3126_v44 }
 0x63d   :  { %v3123_v50 = vpop.xlane.xlu1 %3122 }
 0x63e   :  { %4558 = vpow2.f32 %v3132_v49  ;;  %v3127_v55 = vsub.f32 %v3108_v12, %v3123_v50 }
 0x640   :  { %v4555_v56 = vpop.eup %4554  ;;  %v3134_v60 = vmul.f32 1.442695, %v3127_v55 }
 0x641   :  { %v3136_v62 = vsel %vm1015_vm2, %v4555_v56, 0.0 }
 0x642   :  { %4560 = vpow2.f32 %v3134_v60  ;;  %3137 = vadd.xlane.f32.xlu0 %v3136_v62 }
 0x644   :  { %v4557_v2 = vpop.eup %4556 }
 0x645   :  { %v3139_v6 = vsel %vm1015_vm2, %v4557_v2, 0.0 }
 0x646   :  { %3140 = vadd.xlane.f32.xlu1 %v3139_v6 }
 0x648   :  { %v4559_v14 = vpop.eup %4558 }
 0x649   :  { %v3142_v16 = vsel %vm1015_vm2, %v4559_v14, 0.0 }
 0x64a   :  { %3143 = vadd.xlane.f32.xlu0 %v3142_v16 }
 0x64c   :  { %v4561_v42 = vpop.eup %4560 }
 0x64d   :  { %v3145_v45 = vsel %vm1015_vm2, %v4561_v42, 0.0 }
 0x64e   :  { %3146 = vadd.xlane.f32.xlu1 %v3145_v45 }
 0x6cf   :  { %v3138_v51 = vpop.xlane.xlu0 %3137 }
 0x6d0   :  { %4562 = vrcp.f32 %v3138_v51 }
 0x6d3   :  { %v3141_v53 = vpop.xlane.xlu1 %3140 }
 0x6d4   :  { %4564 = vrcp.f32 %v3141_v53 }
 0x6d7   :  { %v3144_v54 = vpop.xlane.xlu0 %3143 }
 0x6d8   :  { %4566 = vrcp.f32 %v3144_v54 }
 0x6da   :  { %v4563_v57 = vpop.eup %4562 }
 0x6db   :  { %v3152_v61 = vmul.f32 %v4563_v57, %v4555_v56  ;;  %v3147_v30 = vpop.xlane.xlu1 %3146 }
 0x6dc   :  { %4568 = vrcp.f32 %v3147_v30 }
 0x6dd   :  { %4351 = vmatmul.mubr.msk.f32.vlgmr.msra.gmra.mrb[40].mxu0 %vm1015_vm2, %v3152_v61 }
 0x6de   :  { %v4565_v34 = vpop.eup %4564  ;;  %4359 = vmatpush3.msra.mxu0 %v2735_v63  ;;  %4360 = vmatprep.mubr.msk.f32.mxu0 %vm4595_vm0, %v4596_v11 }
 0x6df   :  { %v3153_v0 = vmul.f32 %v4565_v34, %v4557_v2  ;;  %4368 = vmatprep.subr.mxu0 %v4596_v11 }
 0x6e1   :  { %4356 = vmatmul.mubr.msk.f32.vlgmr.msra.gmra.mrb[40].mxu1 %vm1015_vm2, %v3153_v0 }
 0x6e2   :  { %v4567_v22 = vpop.eup %4566  ;;  %4364 = vmatpush3.msra.mxu1 %v2805_v18  ;;  %4365 = vmatprep.mubr.msk.f32.mxu1 %vm4595_vm0, %v4596_v11 }
 0x6e3   :  { %v3154_v46 = vmul.f32 %v4567_v22, %v4559_v14  ;;  %4373 = vmatprep.subr.mxu1 %v4596_v11 }
 0x6e5   :  { %4361 = vmatmul.mubr.msk.f32.vlgmr.msra.gmra.mrb[42].mxu0 %vm1015_vm2, %v3154_v46 }
 0x6e6   :  { %v4569_v40 = vpop.eup %4568  ;;  %4369 = vmatpush3.msra.mxu0 %v5071_v23  ;;  %4370 = vmatprep.mubr.msk.f32.mxu0 %vm4595_vm0, %v4596_v11 }
 0x6e7   :  { %v3155_v7 = vmul.f32 %v4569_v40, %v4561_v42  ;;  %4378 = vmatprep.subr.mxu0 %v4596_v11 }
 0x6e9   :  { %4366 = vmatmul.mubr.msk.f32.vlgmr.msra.gmra.mrb[42].mxu1 %vm1015_vm2, %v3155_v7 }
 0x6ea   :  { %4374 = vmatpush3.msra.mxu1 %v5078_v15  ;;  %4375 = vmatprep.mubr.msk.f32.mxu1 %vm4595_vm0, %v4596_v11 }
 0x6eb   :  { %4383 = vmatprep.subr.mxu1 %v4596_v11 }
 0x7b0   :  { %v3225_v59 = vpop.f32.mrb[40].mxu0 }
 0x7b1   :  { %v4352_v47 = vpop.f32.mrb[41].mxu0  ;;  %4371 = vmatmul.mubr.msk.f32.vlgmr.msra.gmra.mrb[44].mxu0 %vm1015_vm2, %v3225_v59 }
 0x7b2   :  { %4379 = vmatpush3.msra.mxu0 %v5085_v17  ;;  %4380 = vmatprep.mubr.msk.f32.mxu0 %vm4595_vm0, %v4596_v11 }
 0x7b4   :  { %v3298_v23 = vpop.f32.mrb[40].mxu1 }
 0x7b5   :  { %v4357_v9 = vpop.f32.mrb[41].mxu1  ;;  %4376 = vmatmul.mubr.msk.f32.vlgmr.msra.gmra.mrb[44].mxu1 %vm1015_vm2, %v3298_v23 }
 0x7b6   :  { %4384 = vmatpush3.msra.mxu1 %v5095_v27  ;;  %4385 = vmatprep.mubr.msk.f32.mxu1 %vm4595_vm0, %v4596_v11 }
 0x7b8   :  { %v3371_v15 = vpop.f32.mrb[42].mxu0 }
 0x7b9   :  { %v4362_v52 = vpop.f32.mrb[43].mxu0  ;;  %4381 = vmatmul.mubr.msk.f32.vlgmr.msra.gmra.mrb[46].mxu0 %vm1015_vm2, %v3371_v15 }
 0x7bc   :  { %v3444_v10 = vpop.f32.mrb[42].mxu1 }
 0x7bd   :  { %v4367_v48 = vpop.f32.mrb[43].mxu1  ;;  %4386 = vmatmul.mubr.msk.f32.vlgmr.msra.gmra.mrb[46].mxu1 %vm1015_vm2, %v3444_v10 }
 0x884   :  { %v3517_v17 = vpop.f32.mrb[44].mxu0 }
 0x885   :  { %v4372_v21 = vpop.f32.mrb[45].mxu0  ;;  %v3740_v58 = vsel %vm123_vm1, %v3517_v17, 0.0 }
 0x888   :  { %v3590_v24 = vpop.f32.mrb[44].mxu1 }
 0x889   :  { %v3741_v33 = vsel %vm123_vm1, %v3590_v24, 0.0  ;;  %v4377_v28 = vpop.f32.mrb[45].mxu1 }
 0x88a   :  { %v3742_v27 = vadd.f32 %v3741_v33, %v3740_v58 }
 0x88c   :  { %v3663_v1 = vpop.f32.mrb[46].mxu0 }
 0x88d   :  { %v3743_v11 = vsel %vm123_vm1, %v3663_v1, 0.0  ;;  %v4382_v35 = vpop.f32.mrb[47].mxu0 }
 0x88e   :  { %v3744_v29 = vadd.f32 %v3743_v11, %v3742_v27 }
 0x890   :  { %v3736_v36 = vpop.f32.mrb[46].mxu1 }
 0x891   :  { %v3745_v39 = vsel %vm123_vm1, %v3736_v36, 0.0  ;;  %v4387_v41 = vpop.f32.mrb[47].mxu1 }
 0x892   :  { %v3746_v3 = vadd.f32 %v3745_v39, %v3744_v29 }
 0x894   :  { %v3747_v5 = vadd.f32 %v5215_v38, %v3746_v3 }
 0x896   :  { %3749 = vst.msk [vmem:[#allocation2 + $0x8] sm:$0xff] %vm123_vm1, %v3747_v5 }
 0x897   :  { %4581 = shalt.err (!%p4578_p4)
}
 0x898   :  { %s4582_s27 = scalar_lea.hbm %s5320_s9, 256 }
 0x899   :  { %p4583_p5 = scmp.ne.s32.totalorder %s5320_s9, %s4582_s27  ;;  %p4586_p6 = scmp.lt.u32.totalorder %s4582_s27, %s5320_s9 }
 0x89b   :  { %p4588_p7 = pnand %p4586_p6, %p4583_p5 }
 0x89d   :  { %4591 = shalt.err (!%p4588_p7)
}
 0x89e   :  { %s4598_s4 = smov 128   ;;  %s4599_s5 = smov 8  }
 0x89f   :  { %3761 = dma.vmem_to_hbm [thread:$0]  %s3756_s1, 256, %s5320_s9, [#allocation3], %s4598_s4, %s4598_s4, %s4599_s5  }
 0x8a0   :  { %4592 = dma.done.wait [#allocation3], 256  }
 0x8a1   :  { %4593 = vsyncadd [#allocation3], 4294967040 }
 0x8a2   :  { %3765 = vsyncpa [#allocation3], 1 }

</bundles_post_ra>
